<compile_context>
chip_gen: v7x
topology: tpu7x:2x2x1
jax: 0.10.0
libtpu: 0.0.40
codegen_flags: <defaults>
</compile_context>

<pallas_src>
import functools

import jax
import jax.numpy as jnp
from jax.experimental import pallas as pl
from jax.experimental.pallas import tpu as pltpu

LANE = 128   # lane (last-dim) granularity


def _round_up(v, m):
    return (v + m - 1) // m * m


# ---------------------------------------------------------------------------
# Kernel 1: feature transform  Z = X @ W   (bf16 in, f32 accumulate, bf16 out)
# ---------------------------------------------------------------------------
def xw_kernel(x_ref, w_ref, z_ref):
    z_ref[...] = jnp.dot(
        x_ref[...], w_ref[...], preferred_element_type=jnp.float32
    ).astype(z_ref.dtype)


def feature_transform(x, w, *, tm):
    n_p, cin_p = x.shape
    cout_p = w.shape[1]
    return pl.pallas_call(
        xw_kernel,
        out_shape=jax.ShapeDtypeStruct((n_p, cout_p), jnp.bfloat16),
        grid_spec=pltpu.PrefetchScalarGridSpec(
            num_scalar_prefetch=0,
            grid=(n_p // tm,),
            in_specs=[
                pl.BlockSpec((tm, cin_p), lambda i: (i, 0)),       # X row block
                pl.BlockSpec((cin_p, cout_p), lambda i: (0, 0)),   # W resident
            ],
            out_specs=pl.BlockSpec((tm, cout_p), lambda i: (i, 0)),
        ),
        compiler_params=pltpu.CompilerParams(
            dimension_semantics=("parallel",)),
    )(x, w)


# ---------------------------------------------------------------------------
# Kernel 2: aggregation  out = A_hat @ Z + b  (+ optional ReLU)
#   grid = (row tiles, k tiles); f32 VMEM accumulator with pl.when
#   init/finalize; f32 epilogue, single cast at the final store.
# ---------------------------------------------------------------------------
def aggregate_kernel(a_ref, z_ref, b_ref, o_ref, acc_ref, *, apply_relu):
    k = pl.program_id(1)

    @pl.when(k == 0)
    def _():
        acc_ref[...] = jnp.zeros_like(acc_ref)

    acc_ref[...] += jnp.dot(
        a_ref[...], z_ref[...], preferred_element_type=jnp.float32)

    @pl.when(k == pl.num_programs(1) - 1)
    def _():
        out = acc_ref[...] + b_ref[...]          # f32 epilogue
        if apply_relu:
            out = jnp.maximum(out, 0.0)
        o_ref[...] = out.astype(o_ref.dtype)


def aggregate(a_hat, z, b, *, apply_relu, out_dtype, tm, tk):
    n_p = a_hat.shape[0]
    cout_p = z.shape[1]
    kernel = functools.partial(aggregate_kernel, apply_relu=apply_relu)
    return pl.pallas_call(
        kernel,
        out_shape=jax.ShapeDtypeStruct((n_p, cout_p), out_dtype),
        grid_spec=pltpu.PrefetchScalarGridSpec(
            num_scalar_prefetch=0,
            grid=(n_p // tm, n_p // tk),
            in_specs=[
                pl.BlockSpec((tm, tk), lambda i, k: (i, k)),       # A_hat block
                pl.BlockSpec((tk, cout_p), lambda i, k: (k, 0)),   # Z k-block
                pl.BlockSpec((1, cout_p), lambda i, k: (0, 0)),    # bias
            ],
            out_specs=pl.BlockSpec((tm, cout_p), lambda i, k: (i, 0)),
            scratch_shapes=[pltpu.VMEM((tm, cout_p), jnp.float32)],
        ),
        compiler_params=pltpu.CompilerParams(
            dimension_semantics=("parallel", "arbitrary")),
    )(a_hat, z, b)


# ---------------------------------------------------------------------------
# Full 2-layer GCN forward (eval mode: dropout(p=0.5) == identity).
# ---------------------------------------------------------------------------
def gcn_classifier_forward(a_hat, x, w1, b1, w2, b2, *, tile=128):
    n, cin = x.shape
    hidden = w1.shape[1]
    num_classes = w2.shape[1]

    n_p = _round_up(n, tile)
    cin_p = _round_up(cin, LANE)
    h_p = _round_up(hidden, LANE)
    c_p = _round_up(num_classes, LANE)

    def pad2(m, r, c):
        return jnp.pad(m, ((0, r - m.shape[0]), (0, c - m.shape[1])))

    # Lane-dense, bf16 MXU operands (zero padding keeps real rows/cols exact).
    a_p = pad2(a_hat, n_p, n_p).astype(jnp.bfloat16)
    x_p = pad2(x, n_p, cin_p).astype(jnp.bfloat16)
    w1_p = pad2(w1, cin_p, h_p).astype(jnp.bfloat16)
    w2_p = pad2(w2, h_p, c_p).astype(jnp.bfloat16)
    b1_p = pad2(b1, 1, h_p).astype(jnp.float32)
    b2_p = pad2(b2, 1, c_p).astype(jnp.float32)

    # --- layer 1: relu(A_hat @ (X @ W1) + b1) ---
    z1 = feature_transform(x_p, w1_p, tm=tile)                       # [n_p, h_p] bf16
    h = aggregate(a_p, z1, b1_p, apply_relu=True,
                  out_dtype=jnp.bfloat16, tm=tile, tk=tile)          # [n_p, h_p] bf16

    # --- dropout(p=0.5) in eval mode is the identity ---
    # TODO(synk): training-mode dropout would use pltpu.prng_random_bits.

    # --- layer 2: A_hat @ (H @ W2) + b2 ---
    z2 = feature_transform(h, w2_p, tm=tile)                         # [n_p, c_p] bf16
    out = aggregate(a_p, z2, b2_p, apply_relu=False,
                    out_dtype=jnp.float32, tm=tile, tk=tile)         # [n_p, c_p] f32

    return out[:n, :num_classes]


def build_normalized_adjacency(edge_index, num_nodes):
    """Dense A_hat = D^{-1/2} (A + I) D^{-1/2}, matching PyG gcn_norm (glue)."""
    src, dst = edge_index[0], edge_index[1]
    a = jnp.zeros((num_nodes, num_nodes), jnp.float32)
    a = a.at[dst, src].add(1.0)          # edge j -> i (messages flow src -> dst)
    a = jnp.minimum(a, 1.0)              # coalesce duplicate edges like PyG
    a = a + jnp.eye(num_nodes, dtype=jnp.float32)   # add self-loops
    deg = a.sum(axis=1)
    dinv = jax.lax.rsqrt(deg)
    return dinv[:, None] * a * dinv[None, :]


if __name__ == "__main__":
    key = jax.random.PRNGKey(0)

    # Shapes consistent with the module: N admission-note nodes, a stand-in
    # BERT [CLS] feature dim, a small hidden width, and LOS-week classes.
    # (N and the feature dims are deliberately NOT multiples of 128/8 so the
    # padding path is exercised.)
    N, in_channels, hidden_channels, num_classes = 500, 96, 48, 4

    k_x, k_w1, k_b1, k_w2, k_b2 = jax.random.split(key, 5)

    # Node features (stand-in for BERT [CLS] embeddings).
    x = jax.random.normal(k_x, (N, in_channels), jnp.float32)

    # Deterministic undirected ring graph as edge_index [2, E].
    src_ring = jnp.arange(N, dtype=jnp.int32)
    dst_ring = (src_ring + 1) % N
    edge_index = jnp.stack(
        [jnp.concatenate([src_ring, dst_ring]),
         jnp.concatenate([dst_ring, src_ring])], axis=0)             # [2, 2N]

    a_hat = build_normalized_adjacency(edge_index, N)

    # Deterministic parameter init (glorot-ish scale), shapes from __init__.
    w1 = jax.random.normal(k_w1, (in_channels, hidden_channels), jnp.float32) * (
        1.0 / jnp.sqrt(in_channels))
    b1 = jax.random.normal(k_b1, (1, hidden_channels), jnp.float32) * 0.01
    w2 = jax.random.normal(k_w2, (hidden_channels, num_classes), jnp.float32) * (
        1.0 / jnp.sqrt(hidden_channels))
    b2 = jax.random.normal(k_b2, (1, num_classes), jnp.float32) * 0.01

    fwd = jax.jit(gcn_classifier_forward)
    out = fwd(a_hat, x, w1, b1, w2, b2)
    jax.block_until_ready(out)

    # Pure-JAX f32 reference check (kernel uses bf16 MXU inputs -> loose tol).
    ref_h = jnp.maximum(a_hat @ (x @ w1) + b1, 0.0)
    ref = a_hat @ (ref_h @ w2) + b2
    assert out.shape == (N, num_classes)
    assert jnp.allclose(out, ref, atol=5e-2, rtol=5e-2), (
        float(jnp.max(jnp.abs(out - ref))))

    print("KERNEL_OK")
</pallas_src>

<mosaic_0001>
module attributes {stable_mosaic.version = 11 : i64} {
  func.func @xw_kernel(%arg0: i32, %arg1: memref<128x128xbf16, #tpu.memory_space<vmem>>, %arg2: memref<128x128xbf16, #tpu.memory_space<vmem>>, %arg3: memref<128x128xbf16, #tpu.memory_space<vmem>>) attributes {dimension_semantics = [#tpu.dimension_semantics<parallel>], iteration_bounds = array<i64: 4>, scalar_prefetch = 0 : i64, scratch_operands = 0 : i64, tpu.core_type = #tpu.core_type<tc>, window_params = [{transform_indices = @transform_0, window_bounds = array<i64: 128, 128>}, {pipeline_mode = #tpu.pipeline_mode<synchronous>, transform_indices = @transform_1, window_bounds = array<i64: 128, 128>}, {transform_indices = @transform_2, window_bounds = array<i64: 128, 128>}]} {
    %c0 = arith.constant 0 : index
    %c0_0 = arith.constant 0 : index
    %0 = vector.load %arg1[%c0, %c0_0] : memref<128x128xbf16, #tpu.memory_space<vmem>>, vector<128x128xbf16>
    %c0_1 = arith.constant 0 : index
    %c0_2 = arith.constant 0 : index
    %1 = vector.load %arg2[%c0_1, %c0_2] : memref<128x128xbf16, #tpu.memory_space<vmem>>, vector<128x128xbf16>
    %cst = arith.constant dense<0.000000e+00> : vector<128x128xf32>
    %2 = tpu.matmul %0, %1, %cst {dimension_numbers = #tpu.dot_dimension_numbers<[1], [0], [0], [1], [0, 0, 1, 1], [], []>} : vector<128x128xbf16>, vector<128x128xbf16>, vector<128x128xf32> -> vector<128x128xf32>
    %3 = arith.truncf %2 : vector<128x128xf32> to vector<128x128xbf16>
    %c0_3 = arith.constant 0 : index
    %c0_4 = arith.constant 0 : index
    %4 = vector.load %arg3[%c0_3, %c0_4] : memref<128x128xbf16, #tpu.memory_space<vmem>>, vector<128x128xbf16>
    tpu.vector_store %arg3[%c0_3, %c0_4], %3 {strides = array<i32>} : memref<128x128xbf16, #tpu.memory_space<vmem>>, vector<128x128xbf16>,
    return
  }
  func.func @transform_0(%arg0: i32) -> (i32, i32) {
    %c0_i32 = arith.constant 0 : i32
    %c0_i32_0 = arith.constant 0 : i32
    return %arg0, %c0_i32 : i32, i32
  }
  func.func @transform_1(%arg0: i32) -> (i32, i32) {
    %c0_i32 = arith.constant 0 : i32
    %c0_i32_0 = arith.constant 0 : i32
    %c0_i32_1 = arith.constant 0 : i32
    return %c0_i32, %c0_i32_0 : i32, i32
  }
  func.func @transform_2(%arg0: i32) -> (i32, i32) {
    %c0_i32 = arith.constant 0 : i32
    %c0_i32_0 = arith.constant 0 : i32
    return %arg0, %c0_i32 : i32, i32
  }
}

module attributes {stable_mosaic.version = 11 : i64} {
  func.func @aggregate_kernel(%arg0: i32, %arg1: i32, %arg2: memref<128x128xbf16, #tpu.memory_space<vmem>>, %arg3: memref<128x128xbf16, #tpu.memory_space<vmem>>, %arg4: memref<1x128xf32, #tpu.memory_space<vmem>>, %arg5: memref<128x128xbf16, #tpu.memory_space<vmem>>, %arg6: memref<128x128xf32, #tpu.memory_space<vmem>>) attributes {dimension_semantics = [#tpu.dimension_semantics<parallel>, #tpu.dimension_semantics<arbitrary>], iteration_bounds = array<i64: 4, 4>, scalar_prefetch = 0 : i64, scratch_operands = 1 : i64, tpu.core_type = #tpu.core_type<tc>, window_params = [{transform_indices = @transform_0, window_bounds = array<i64: 128, 128>}, {transform_indices = @transform_1, window_bounds = array<i64: 128, 128>}, {pipeline_mode = #tpu.pipeline_mode<synchronous>, transform_indices = @transform_2, window_bounds = array<i64: 1, 128>}, {transform_indices = @transform_3, window_bounds = array<i64: 128, 128>}]} {
    %c0_i32 = arith.constant 0 : i32
    %0 = arith.cmpi eq, %arg1, %c0_i32 : i32
    %1 = arith.extui %0 : i1 to i32
    %c0_i32_0 = arith.constant 0 : i32
    %2 = arith.cmpi ne, %1, %c0_i32_0 : i32
    scf.if %2 {
      %cst_9 = arith.constant 0.000000e+00 : f32
      %12 = vector.broadcast %cst_9 : f32 to vector<128x128xf32>
      %c0_10 = arith.constant 0 : index
      %c0_11 = arith.constant 0 : index
      %13 = vector.load %arg6[%c0_10, %c0_11] : memref<128x128xf32, #tpu.memory_space<vmem>>, vector<128x128xf32>
      tpu.vector_store %arg6[%c0_10, %c0_11], %12 {strides = array<i32>} : memref<128x128xf32, #tpu.memory_space<vmem>>, vector<128x128xf32>,
    } else {
    }
    %c0 = arith.constant 0 : index
    %c0_1 = arith.constant 0 : index
    %3 = vector.load %arg6[%c0, %c0_1] : memref<128x128xf32, #tpu.memory_space<vmem>>, vector<128x128xf32>
    %c0_2 = arith.constant 0 : index
    %c0_3 = arith.constant 0 : index
    %4 = vector.load %arg2[%c0_2, %c0_3] : memref<128x128xbf16, #tpu.memory_space<vmem>>, vector<128x128xbf16>
    %c0_4 = arith.constant 0 : index
    %c0_5 = arith.constant 0 : index
    %5 = vector.load %arg3[%c0_4, %c0_5] : memref<128x128xbf16, #tpu.memory_space<vmem>>, vector<128x128xbf16>
    %cst = arith.constant dense<0.000000e+00> : vector<128x128xf32>
    %6 = tpu.matmul %4, %5, %cst {dimension_numbers = #tpu.dot_dimension_numbers<[1], [0], [0], [1], [0, 0, 1, 1], [], []>} : vector<128x128xbf16>, vector<128x128xbf16>, vector<128x128xf32> -> vector<128x128xf32>
    %7 = arith.addf %3, %6 : vector<128x128xf32>
    %c0_6 = arith.constant 0 : index
    %c0_7 = arith.constant 0 : index
    %8 = vector.load %arg6[%c0_6, %c0_7] : memref<128x128xf32, #tpu.memory_space<vmem>>, vector<128x128xf32>
    tpu.vector_store %arg6[%c0_6, %c0_7], %7 {strides = array<i32>} : memref<128x128xf32, #tpu.memory_space<vmem>>, vector<128x128xf32>,
    %c3_i32 = arith.constant 3 : i32
    %9 = arith.cmpi eq, %arg1, %c3_i32 : i32
    %10 = arith.extui %9 : i1 to i32
    %c0_i32_8 = arith.constant 0 : i32
    %11 = arith.cmpi ne, %10, %c0_i32_8 : i32
    scf.if %11 {
      %c0_9 = arith.constant 0 : index
      %c0_10 = arith.constant 0 : index
      %12 = vector.load %arg6[%c0_9, %c0_10] : memref<128x128xf32, #tpu.memory_space<vmem>>, vector<128x128xf32>
      %c0_11 = arith.constant 0 : index
      %c0_12 = arith.constant 0 : index
      %13 = vector.load %arg4[%c0_11, %c0_12] : memref<1x128xf32, #tpu.memory_space<vmem>>, vector<1x128xf32>
      %14 = vector.broadcast %13 : vector<1x128xf32> to vector<128x128xf32>
      %15 = arith.addf %12, %14 : vector<128x128xf32>
      %cst_13 = arith.constant 0.000000e+00 : f32
      %16 = vector.broadcast %cst_13 : f32 to vector<128x128xf32>
      %17 = arith.maximumf %15, %16 : vector<128x128xf32>
      %18 = arith.truncf %17 : vector<128x128xf32> to vector<128x128xbf16>
      %c0_14 = arith.constant 0 : index
      %c0_15 = arith.constant 0 : index
      %19 = vector.load %arg5[%c0_14, %c0_15] : memref<128x128xbf16, #tpu.memory_space<vmem>>, vector<128x128xbf16>
      tpu.vector_store %arg5[%c0_14, %c0_15], %18 {strides = array<i32>} : memref<128x128xbf16, #tpu.memory_space<vmem>>, vector<128x128xbf16>,
    } else {
    }
    return
  }
  func.func @transform_0(%arg0: i32, %arg1: i32) -> (i32, i32) {
    %c0_i32 = arith.constant 0 : i32
    return %arg0, %arg1 : i32, i32
  }
  func.func @transform_1(%arg0: i32, %arg1: i32) -> (i32, i32) {
    %c0_i32 = arith.constant 0 : i32
    %c0_i32_0 = arith.constant 0 : i32
    return %arg1, %c0_i32 : i32, i32
  }
  func.func @transform_2(%arg0: i32, %arg1: i32) -> (i32, i32) {
    %c0_i32 = arith.constant 0 : i32
    %c0_i32_0 = arith.constant 0 : i32
    %c0_i32_1 = arith.constant 0 : i32
    return %c0_i32, %c0_i32_0 : i32, i32
  }
  func.func @transform_3(%arg0: i32, %arg1: i32) -> (i32, i32) {
    %c0_i32 = arith.constant 0 : i32
    %c0_i32_0 = arith.constant 0 : i32
    return %arg0, %c0_i32 : i32, i32
  }
}

module attributes {stable_mosaic.version = 11 : i64} {
  func.func @aggregate_kernel(%arg0: i32, %arg1: i32, %arg2: memref<128x128xbf16, #tpu.memory_space<vmem>>, %arg3: memref<128x128xbf16, #tpu.memory_space<vmem>>, %arg4: memref<1x128xf32, #tpu.memory_space<vmem>>, %arg5: memref<128x128xf32, #tpu.memory_space<vmem>>, %arg6: memref<128x128xf32, #tpu.memory_space<vmem>>) attributes {dimension_semantics = [#tpu.dimension_semantics<parallel>, #tpu.dimension_semantics<arbitrary>], iteration_bounds = array<i64: 4, 4>, scalar_prefetch = 0 : i64, scratch_operands = 1 : i64, tpu.core_type = #tpu.core_type<tc>, window_params = [{transform_indices = @transform_0, window_bounds = array<i64: 128, 128>}, {transform_indices = @transform_1, window_bounds = array<i64: 128, 128>}, {pipeline_mode = #tpu.pipeline_mode<synchronous>, transform_indices = @transform_2, window_bounds = array<i64: 1, 128>}, {transform_indices = @transform_3, window_bounds = array<i64: 128, 128>}]} {
    %c0_i32 = arith.constant 0 : i32
    %0 = arith.cmpi eq, %arg1, %c0_i32 : i32
    %1 = arith.extui %0 : i1 to i32
    %c0_i32_0 = arith.constant 0 : i32
    %2 = arith.cmpi ne, %1, %c0_i32_0 : i32
    scf.if %2 {
      %cst_9 = arith.constant 0.000000e+00 : f32
      %12 = vector.broadcast %cst_9 : f32 to vector<128x128xf32>
      %c0_10 = arith.constant 0 : index
      %c0_11 = arith.constant 0 : index
      %13 = vector.load %arg6[%c0_10, %c0_11] : memref<128x128xf32, #tpu.memory_space<vmem>>, vector<128x128xf32>
      tpu.vector_store %arg6[%c0_10, %c0_11], %12 {strides = array<i32>} : memref<128x128xf32, #tpu.memory_space<vmem>>, vector<128x128xf32>,
    } else {
    }
    %c0 = arith.constant 0 : index
    %c0_1 = arith.constant 0 : index
    %3 = vector.load %arg6[%c0, %c0_1] : memref<128x128xf32, #tpu.memory_space<vmem>>, vector<128x128xf32>
    %c0_2 = arith.constant 0 : index
    %c0_3 = arith.constant 0 : index
    %4 = vector.load %arg2[%c0_2, %c0_3] : memref<128x128xbf16, #tpu.memory_space<vmem>>, vector<128x128xbf16>
    %c0_4 = arith.constant 0 : index
    %c0_5 = arith.constant 0 : index
    %5 = vector.load %arg3[%c0_4, %c0_5] : memref<128x128xbf16, #tpu.memory_space<vmem>>, vector<128x128xbf16>
    %cst = arith.constant dense<0.000000e+00> : vector<128x128xf32>
    %6 = tpu.matmul %4, %5, %cst {dimension_numbers = #tpu.dot_dimension_numbers<[1], [0], [0], [1], [0, 0, 1, 1], [], []>} : vector<128x128xbf16>, vector<128x128xbf16>, vector<128x128xf32> -> vector<128x128xf32>
    %7 = arith.addf %3, %6 : vector<128x128xf32>
    %c0_6 = arith.constant 0 : index
    %c0_7 = arith.constant 0 : index
    %8 = vector.load %arg6[%c0_6, %c0_7] : memref<128x128xf32, #tpu.memory_space<vmem>>, vector<128x128xf32>
    tpu.vector_store %arg6[%c0_6, %c0_7], %7 {strides = array<i32>} : memref<128x128xf32, #tpu.memory_space<vmem>>, vector<128x128xf32>,
    %c3_i32 = arith.constant 3 : i32
    %9 = arith.cmpi eq, %arg1, %c3_i32 : i32
    %10 = arith.extui %9 : i1 to i32
    %c0_i32_8 = arith.constant 0 : i32
    %11 = arith.cmpi ne, %10, %c0_i32_8 : i32
    scf.if %11 {
      %c0_9 = arith.constant 0 : index
      %c0_10 = arith.constant 0 : index
      %12 = vector.load %arg6[%c0_9, %c0_10] : memref<128x128xf32, #tpu.memory_space<vmem>>, vector<128x128xf32>
      %c0_11 = arith.constant 0 : index
      %c0_12 = arith.constant 0 : index
      %13 = vector.load %arg4[%c0_11, %c0_12] : memref<1x128xf32, #tpu.memory_space<vmem>>, vector<1x128xf32>
      %14 = vector.broadcast %13 : vector<1x128xf32> to vector<128x128xf32>
      %15 = arith.addf %12, %14 : vector<128x128xf32>
      %c0_13 = arith.constant 0 : index
      %c0_14 = arith.constant 0 : index
      %16 = vector.load %arg5[%c0_13, %c0_14] : memref<128x128xf32, #tpu.memory_space<vmem>>, vector<128x128xf32>
      tpu.vector_store %arg5[%c0_13, %c0_14], %15 {strides = array<i32>} : memref<128x128xf32, #tpu.memory_space<vmem>>, vector<128x128xf32>,
    } else {
    }
    return
  }
  func.func @transform_0(%arg0: i32, %arg1: i32) -> (i32, i32) {
    %c0_i32 = arith.constant 0 : i32
    return %arg0, %arg1 : i32, i32
  }
  func.func @transform_1(%arg0: i32, %arg1: i32) -> (i32, i32) {
    %c0_i32 = arith.constant 0 : i32
    %c0_i32_0 = arith.constant 0 : i32
    return %arg1, %c0_i32 : i32, i32
  }
  func.func @transform_2(%arg0: i32, %arg1: i32) -> (i32, i32) {
    %c0_i32 = arith.constant 0 : i32
    %c0_i32_0 = arith.constant 0 : i32
    %c0_i32_1 = arith.constant 0 : i32
    return %c0_i32, %c0_i32_0 : i32, i32
  }
  func.func @transform_3(%arg0: i32, %arg1: i32) -> (i32, i32) {
    %c0_i32 = arith.constant 0 : i32
    %c0_i32_0 = arith.constant 0 : i32
    return %arg0, %c0_i32 : i32, i32
  }
}

</mosaic_0001>

<bundles_post_ra>
// kernel: gcn_classifier_forward.4
= control target key start
LH: loop header
LB: loop body
LE: loop exit
PB: predicated region body
PF: predicated region fallthrough
CT: control target
= control target key end

     0   :  { %s726_s9 = smov 0   ;;  %s784_s0 = inlined_call_operand.vmem [shape: bf16[512,128], index: 0, kind: input, shape index: {}]   ;;  %s785_s1 = inlined_call_operand.vmem [shape: bf16[128,128], index: 1, kind: input, shape index: {}]   ;;  %s786_s2 = inlined_call_operand.vmem [shape: bf16[512,128], index: 2, kind: output, shape index: {}]  }
   0x1 LB: > { %s509_s10 = sadd.s32 4294967295, %s709_s9   ;;  %p513_p0 = scmp.ge.s32.totalorder %s709_s9, 1  ;;  %s709_s9 = sphi %s726_s9, %s12_s9  }
   0x2   : > { %p113_p1 = scmp.lt.s32.totalorder %s709_s9, 5 }
   0x4   : > { %p114_p2 = pnand %p513_p0, %p113_p1 }
   0x5   : > { %v687_v0 = vld [vmem:[%s785_s1] sm:$0xff] (!%p114_p2)   ;;  %s514_s13 = sshll.u32 (!%p114_p2), %s509_s10, 4  ;;  %v688_v1 = vld [vmem:[%s785_s1 + $0x8] sm:$0xff] (!%p114_p2)   ;;  %v689_v2 = vld [vmem:[%s785_s1 + $0x10] sm:$0xff] (!%p114_p2)  }
   0x6   : > { %117 = sbr.rel (%p114_p2) target bundleno = 264 (0x108), region = 28  ;;  %p136_p3 = scmp.lt.s32.totalorder (!%p114_p2), %s514_s13, 63  ;;  %631 = vmatprep.subr.bf16.mxu0 (!%p114_p2), %v687_v0  ;;  %663 = vmatprep.subr.bf16.mxu1 (!%p114_p2), %v687_v0  ;;  %v690_v3 = vld [vmem:[%s785_s1 + $0x18] sm:$0xff] (!%p114_p2)   ;;  %v691_v6 = vld [vmem:[%s785_s1 + $0x20] sm:$0xff] (!%p114_p2)   ;;  %v692_v7 = vld [vmem:[%s785_s1 + $0x28] sm:$0xff] (!%p114_p2)  }
   0x7   : > { %632 = vmatpush3.bf16.msra.mxu0 (!%p114_p2), %v687_v0  ;;  %671 = vmatpush3.bf16.msra.mxu1 (!%p114_p2), %v687_v0  ;;  %v693_v8 = vld [vmem:[%s785_s1 + $0x30] sm:$0xff] (!%p114_p2)   ;;  %v694_v9 = vld [vmem:[%s785_s1 + $0x38] sm:$0xff] (!%p114_p2)  }
   0x8   : > { %633 = vmatprep.subr.bf16.mxu0 (!%p114_p2), %v688_v1  ;;  %664 = vmatprep.subr.bf16.mxu1 (!%p114_p2), %v688_v1 }
   0xb   : > { %634 = vmatpush3.bf16.msra.mxu0 (!%p114_p2), %v688_v1  ;;  %672 = vmatpush3.bf16.msra.mxu1 (!%p114_p2), %v688_v1 }
   0xc   : > { %635 = vmatprep.subr.bf16.mxu0 (!%p114_p2), %v689_v2  ;;  %665 = vmatprep.subr.bf16.mxu1 (!%p114_p2), %v689_v2 }
   0xd   : > { %s788_s13 = smov (!%p136_p3, %s514_s13), 63 }
   0xe   : > { %s515_s18 = sshll.u32 %s788_s13, 2 }
   0xf   : > { %s751_s21 = scalar_lea.vmem %s784_s0, %s515_s18  ;;  %636 = vmatpush3.bf16.msra.mxu0 %v689_v2  ;;  %673 = vmatpush3.bf16.msra.mxu1 %v689_v2  ;;  %s145_s6 = scalar_lea.vmem %s786_s2, %s515_s18 }
  0x10   : > { %v695_v4 = vld [vmem:[%s751_s21] sm:$0xff]   ;;  %637 = vmatprep.subr.bf16.mxu0 %v690_v3  ;;  %666 = vmatprep.subr.bf16.mxu1 %v690_v3  ;;  %v697_v10 = vld [vmem:[%s751_s21 + $0x8] sm:$0xff]   ;;  %v699_v12 = vld [vmem:[%s751_s21 + $0x10] sm:$0xff]  }
  0x11   : > { %v696_v5 = vld [vmem:[%s751_s21 + $0x20] sm:$0xff]   ;;  %647 = vmatprep.mubr.bf16.mxu0 %v695_v4  ;;  %v698_v11 = vld [vmem:[%s751_s21 + $0x28] sm:$0xff]   ;;  %v700_v13 = vld [vmem:[%s751_s21 + $0x30] sm:$0xff]  }
  0x12   : > { %655 = vmatprep.mubr.bf16.mxu1 %v696_v5  ;;  %v701_v14 = vld [vmem:[%s751_s21 + $0x18] sm:$0xff]  }
  0x13   : > { %638 = vmatpush3.bf16.msra.mxu0 %v690_v3  ;;  %674 = vmatpush3.bf16.msra.mxu1 %v690_v3  ;;  %v702_v15 = vld [vmem:[%s751_s21 + $0x38] sm:$0xff]  }
  0x14   : > { %639 = vmatprep.subr.bf16.mxu0 %v691_v6  ;;  %667 = vmatprep.subr.bf16.mxu1 %v691_v6 }
  0x17   : > { %640 = vmatpush3.bf16.msra.mxu0 %v691_v6  ;;  %675 = vmatpush3.bf16.msra.mxu1 %v691_v6 }
  0x18   : > { %641 = vmatprep.subr.bf16.mxu0 %v692_v7  ;;  %668 = vmatprep.subr.bf16.mxu1 %v692_v7 }
  0x1b   : > { %642 = vmatpush3.bf16.msra.mxu0 %v692_v7  ;;  %676 = vmatpush3.bf16.msra.mxu1 %v692_v7 }
  0x1c   : > { %643 = vmatprep.subr.bf16.mxu0 %v693_v8  ;;  %669 = vmatprep.subr.bf16.mxu1 %v693_v8 }
  0x1f   : > { %644 = vmatpush3.bf16.msra.mxu0 %v693_v8  ;;  %677 = vmatpush3.bf16.msra.mxu1 %v693_v8 }
  0x20   : > { %645 = vmatprep.subr.bf16.mxu0 %v694_v9  ;;  %670 = vmatprep.subr.bf16.mxu1 %v694_v9 }
  0x23   : > { %646 = vmatpush3.bf16.msra.mxu0 %v694_v9  ;;  %678 = vmatpush3.bf16.msra.mxu1 %v694_v9 }
  0x26   : > { %648 = vmatmul.mubr.bf16.vlgmr.msra.gmra.mrb[0].mxu0 %v697_v10  ;;  %656 = vmatmul.mubr.bf16.vlgmr.msra.gmra.mrb[0].mxu1 %v698_v11 }
  0x27   : > { %651 = vmatprep.mubr.bf16.mxu0 %v699_v12  ;;  %659 = vmatprep.mubr.bf16.mxu1 %v700_v13 }
  0x2e   : > { %652 = vmatmul.mubr.bf16.gmra.mrb[4].mxu0 %v701_v14  ;;  %660 = vmatmul.mubr.bf16.gmra.mrb[4].mxu1 %v702_v15 }
  0xf9   : > { %v649_v16 = vpop.f32.mrb[0].mxu0  ;;  %v657_v17 = vpop.f32.mrb[0].mxu1 }
  0xfa   : > { %v310_v18 = vpop.f32.mrb[1].mxu0  ;;  %v342_v19 = vpop.f32.mrb[1].mxu1 }
  0xfb   : > { %v650_v20 = vpop.f32.mrb[2].mxu0  ;;  %v658_v21 = vpop.f32.mrb[2].mxu1 }
  0xfc   : > { %v576_v22 = vpack.c.bf16 %v650_v20, %v649_v16  ;;  %v596_v23 = vpack.c.bf16 %v658_v21, %v657_v17  ;;  %v313_v24 = vpop.f32.mrb[3].mxu0  ;;  %v345_v25 = vpop.f32.mrb[3].mxu1 }
  0xfd   : > { %v571_v26 = vpack.c.bf16 %v313_v24, %v310_v18  ;;  %v591_v27 = vpack.c.bf16 %v345_v25, %v342_v19 }
  0xfe   : > { %608 = vst [vmem:[%s145_s6 + $0x8] sm:$0xff] %v576_v22   ;;  %612 = vst [vmem:[%s145_s6 + $0x28] sm:$0xff] %v596_v23  }
  0xff   : > { %572 = vst [vmem:[%s145_s6] sm:$0xff] %v571_v26   ;;  %611 = vst [vmem:[%s145_s6 + $0x20] sm:$0xff] %v591_v27  }
 0x101   : > { %v653_v28 = vpop.f32.mrb[4].mxu0  ;;  %v661_v29 = vpop.f32.mrb[4].mxu1 }
 0x102   : > { %v326_v30 = vpop.f32.mrb[5].mxu0  ;;  %v358_v31 = vpop.f32.mrb[5].mxu1 }
 0x103   : > { %v654_v32 = vpop.f32.mrb[6].mxu0  ;;  %v662_v33 = vpop.f32.mrb[6].mxu1 }
 0x104   : > { %v586_v34 = vpack.c.bf16 %v654_v32, %v653_v28  ;;  %v606_v35 = vpack.c.bf16 %v662_v33, %v661_v29  ;;  %v329_v36 = vpop.f32.mrb[7].mxu0  ;;  %v361_v37 = vpop.f32.mrb[7].mxu1 }
 0x105   : > { %v581_v38 = vpack.c.bf16 %v329_v36, %v326_v30  ;;  %v601_v39 = vpack.c.bf16 %v361_v37, %v358_v31 }
 0x106   : > { %610 = vst [vmem:[%s145_s6 + $0x18] sm:$0xff] %v586_v34   ;;  %614 = vst [vmem:[%s145_s6 + $0x38] sm:$0xff] %v606_v35  }
 0x107   : > { %609 = vst [vmem:[%s145_s6 + $0x10] sm:$0xff] %v581_v38   ;;  %613 = vst [vmem:[%s145_s6 + $0x30] sm:$0xff] %v601_v39  }
 0x108 PF: > { %s12_s9 = sadd.s32 1, %s709_s9  }
 0x109   : > { %p9_p4 = scmp.ge.s32.totalorder %s12_s9, 6  }
 0x10b   :  { %11 = sbr.rel (!%p9_p4) target bundleno = 1 (0x1), region = 58 }

// kernel: gcn_classifier_forward.5
= control target key start
LH: loop header
LB: loop body
LE: loop exit
PB: predicated region body
PF: predicated region fallthrough
CT: control target
= control target key end

     0   :  { %s1163_s12 = smov 0   ;;  %s1165_s13 = smov 0   ;;  %s1308_s0 = inlined_call_operand.vmem [shape: bf16[512,512], index: 0, kind: input, shape index: {}]   ;;  %s1309_s1 = inlined_call_operand.vmem [shape: bf16[512,128], index: 1, kind: input, shape index: {}]   ;;  %s1310_s2 = inlined_call_operand.vmem [shape: f32[1,128], index: 2, kind: input, shape index: {}]   ;;  %s1311_s3 = inlined_call_operand.vmem [shape: bf16[512,128], index: 3, kind: output, shape index: {}]  }
   0x1   :  { %s1167_s14 = smov 0   ;;  %s1169_s15 = smov 0  }
   0x2   :  { %s1171_s16 = smov 0   ;;  %s1173_s17 = smov 0  }
   0x3   :  { %s1175_s18 = smov 0  }
   0x4 LB: > { %s22_s19 = sadd.s32 1, %s1132_s16  ;;  %s25_s20 = sadd.s32 1, %s1136_s17  ;;  %s1140_s18 = sphi %s1175_s18, %s13_s18   ;;  %s1136_s17 = sphi %s1173_s17, %s1317_s17   ;;  %s1132_s16 = sphi %s1171_s16, %s1316_s16   ;;  %s1128_s15 = sphi %s1169_s15, %s1315_s15   ;;  %s1124_s14 = sphi %s1167_s14, %s1314_s14   ;;  %s1120_s13 = sphi %s1165_s13, %s1313_s13   ;;  %s1116_s12 = sphi %s1163_s12, %s1312_s12  }
   0x5   : > { %p23_p0 = scmp.ge.s32.totalorder %s22_s19, 4  ;;  %p41_p1 = scmp.ne.s32.totalorder %s1120_s13, %s1116_s12 }
   0x6   : > { %p42_p2 = scmp.eq.s32.totalorder %s1140_s18, 0  ;;  %s34_s24 = sadd.s32 1, %s1120_s13 }
   0x7   : > { %s1319_s19 = smov (%p23_p0, %s22_s19), 0  ;;  %s1321_s20 = smov (!%p23_p0, %s25_s20), %s1136_s17 }
   0x8   : > { %p43_p3 = por %p42_p2, %p41_p1  ;;  %p27_p4 = scmp.ge.s32.totalorder %s1321_s20, 4 }
   0x9   : > { %s30_s21 = ssub.s32 %s1132_s16, %s1319_s19  ;;  %p837_p6 = scmp.ge.s32.totalorder %s1140_s18, 16 }
   0xa   : > { %s1323_s20 = smov (%p27_p4, %s1321_s20), 0 }
   0xb   : > { %s29_s22 = ssub.s32 %s1136_s17, %s1323_s20  ;;  %143 = sbr.rel (%p837_p6) target bundleno = 35 (0x23), region = 20 }
   0xc   : > { %s31_s23 = sor.u32 %s30_s21, %s29_s22 }
   0xd   : > { %p32_p5 = scmp.eq.s32.totalorder %s31_s23, 0 }
   0xf   : > { %s1214_s25 = scalar_select %p32_p5, %s1120_s13, %s34_s24  }
  0x12   : > { %146 = sbr.rel (!%p43_p3) target bundleno = 35 (0x23), region = 24  ;;  %s148_s26 = sand.u32 (%p43_p3), 1, %s1120_s13  }
  0x13   : > { %s885_s27 = sshll.u32 (%p43_p3), %s1136_s17, 6  ;;  %s838_s28 = sshll.u32 (%p43_p3), %s148_s26, 6 }
  0x14   : > { %s153_s29 = sadd.s32 (%p43_p3), %s1132_s16, %s885_s27  ;;  %s150_s7 = scalar_lea.vmem (%p43_p3), [#allocation3], %s838_s28 }
  0x15   : > { %s841_s30 = sshll.u32 (%p43_p3), %s153_s29, 2 }
  0x16   : > { %s1223_s6 = scalar_lea.vmem (%p43_p3), %s1308_s0, %s841_s30 }
  0x17   : > { %v171_v0 = vld [vmem:[%s1223_s6] sm:$0xf] (%p43_p3)  ;;  %v173_v1 = vld [vmem:[%s1223_s6 + $0x10] sm:$0xf] (%p43_p3) }
  0x18   : > { %v175_v2 = vld [vmem:[%s1223_s6 + $0x20] sm:$0xf] (%p43_p3)  ;;  %172 = vst [vmem:[%s150_s7] sm:$0xf] (%p43_p3), %v171_v0  ;;  %174 = vst [vmem:[%s150_s7 + $0x4] sm:$0xf] (%p43_p3), %v173_v1 }
  0x19   : > { %176 = vst [vmem:[%s150_s7 + $0x8] sm:$0xf] %v175_v2  ;;  %v177_v3 = vld [vmem:[%s1223_s6 + $0x30] sm:$0xf]  ;;  %v179_v4 = vld [vmem:[%s1223_s6 + $0x40] sm:$0xf] }
  0x1a   : > { %v181_v5 = vld [vmem:[%s1223_s6 + $0x50] sm:$0xf]  ;;  %178 = vst [vmem:[%s150_s7 + $0xc] sm:$0xf] %v177_v3  ;;  %180 = vst [vmem:[%s150_s7 + $0x10] sm:$0xf] %v179_v4 }
  0x1b   : > { %182 = vst [vmem:[%s150_s7 + $0x14] sm:$0xf] %v181_v5  ;;  %v183_v6 = vld [vmem:[%s1223_s6 + $0x60] sm:$0xf]  ;;  %v185_v7 = vld [vmem:[%s1223_s6 + $0x70] sm:$0xf] }
  0x1c   : > { %v187_v8 = vld [vmem:[%s1223_s6 + $0x80] sm:$0xf]  ;;  %184 = vst [vmem:[%s150_s7 + $0x18] sm:$0xf] %v183_v6  ;;  %186 = vst [vmem:[%s150_s7 + $0x1c] sm:$0xf] %v185_v7 }
  0x1d   : > { %188 = vst [vmem:[%s150_s7 + $0x20] sm:$0xf] %v187_v8  ;;  %v189_v9 = vld [vmem:[%s1223_s6 + $0x90] sm:$0xf]  ;;  %v191_v10 = vld [vmem:[%s1223_s6 + $0xa0] sm:$0xf] }
  0x1e   : > { %v193_v11 = vld [vmem:[%s1223_s6 + $0xb0] sm:$0xf]  ;;  %190 = vst [vmem:[%s150_s7 + $0x24] sm:$0xf] %v189_v9  ;;  %192 = vst [vmem:[%s150_s7 + $0x28] sm:$0xf] %v191_v10 }
  0x1f   : > { %194 = vst [vmem:[%s150_s7 + $0x2c] sm:$0xf] %v193_v11  ;;  %v195_v12 = vld [vmem:[%s1223_s6 + $0xc0] sm:$0xf]  ;;  %v197_v13 = vld [vmem:[%s1223_s6 + $0xd0] sm:$0xf] }
  0x20   : > { %v199_v14 = vld [vmem:[%s1223_s6 + $0xe0] sm:$0xf]  ;;  %196 = vst [vmem:[%s150_s7 + $0x30] sm:$0xf] %v195_v12  ;;  %198 = vst [vmem:[%s150_s7 + $0x34] sm:$0xf] %v197_v13 }
  0x21   : > { %200 = vst [vmem:[%s150_s7 + $0x38] sm:$0xf] %v199_v14  ;;  %v201_v15 = vld [vmem:[%s1223_s6 + $0xf0] sm:$0xf] }
  0x22   : > { %202 = vst [vmem:[%s150_s7 + $0x3c] sm:$0xf] %v201_v15 }
  0x23 PF: > { %p842_p7 = scmp.ge.s32.totalorder %s1140_s18, 1  ;;  %p265_p8 = scmp.lt.s32.totalorder %s1140_s18, 17 }
  0x25   : > { %p266_p9 = pnand %p842_p7, %p265_p8 }
  0x26   : > { %s272_s8 = sand.u32 (!%p266_p9), 1, %s1116_s12   ;;  %s844_s9 = sshll.u32 (!%p266_p9), %s1124_s14, 4 }
  0x27   : > { %269 = sbr.rel (%p266_p9) target bundleno = 330 (0x14a), region = 69  ;;  %s843_s10 = sshll.u32 (!%p266_p9), %s272_s8, 6 }
  0x28   : > { %p302_p10 = scmp.lt.s32.totalorder (!%p266_p9), %s844_s9, 63  ;;  %s846_s11 = sshll.u32 (!%p266_p9), %s1128_s15, 4 }
  0x29   : > { %p308_p11 = scmp.lt.s32.totalorder (!%p266_p9), %s846_s11, 63  ;;  %s1256_s12 = scalar_lea.vmem (!%p266_p9), [#allocation3], %s843_s10 }
  0x2a   : > { %p848_p12 = scmp.ne.s32.totalorder (!%p266_p9), %s1124_s14, 0 }
  0x2e   : > { %s1325_s9 = smov (!%p302_p10, %s844_s9), 63  ;;  %s1327_s11 = smov (!%p308_p11, %s846_s11), 63 }
  0x2f   : > { %s845_s21 = sshll.u32 %s1325_s9, 2  ;;  %s847_s26 = sshll.u32 %s1327_s11, 2  ;;  %v1142_v16 = vmov (!%p848_p12), 0.0  }
  0x30   : > { %s1249_s24 = scalar_lea.vmem %s1309_s1, %s845_s21  ;;  %s1254_s29 = scalar_lea.vmem %s1311_s3, %s847_s26  ;;  %318 = vst [vmem:[#allocation2] sm:$0xff] (!%p848_p12), %v1142_v16  ;;  %319 = vst [vmem:[#allocation2 + $0x8] sm:$0xff] (!%p848_p12), %v1142_v16 }
  0x31   : > { %317 = sbr.rel (%p848_p12) target bundleno = 56 (0x38), region = 77  ;;  %320 = vst [vmem:[#allocation2 + $0x10] sm:$0xff] (!%p848_p12), %v1142_v16  ;;  %321 = vst [vmem:[#allocation2 + $0x18] sm:$0xff] (!%p848_p12), %v1142_v16 }
  0x32   : > { %322 = vst [vmem:[#allocation2 + $0x20] sm:$0xff] (!%p848_p12), %v1142_v16  ;;  %323 = vst [vmem:[#allocation2 + $0x28] sm:$0xff] (!%p848_p12), %v1142_v16 }
  0x33   : > { %324 = vst [vmem:[#allocation2 + $0x30] sm:$0xff] (!%p848_p12), %v1142_v16  ;;  %325 = vst [vmem:[#allocation2 + $0x38] sm:$0xff] (!%p848_p12), %v1142_v16 }
  0x34   : > { %326 = vst [vmem:[#allocation2 + $0x40] sm:$0xff] (!%p848_p12), %v1142_v16  ;;  %327 = vst [vmem:[#allocation2 + $0x48] sm:$0xff] (!%p848_p12), %v1142_v16 }
  0x35   : > { %328 = vst [vmem:[#allocation2 + $0x50] sm:$0xff] (!%p848_p12), %v1142_v16  ;;  %329 = vst [vmem:[#allocation2 + $0x58] sm:$0xff] (!%p848_p12), %v1142_v16 }
  0x36   : > { %330 = vst [vmem:[#allocation2 + $0x60] sm:$0xff] (!%p848_p12), %v1142_v16  ;;  %331 = vst [vmem:[#allocation2 + $0x68] sm:$0xff] (!%p848_p12), %v1142_v16 }
  0x37   : > { %332 = vst [vmem:[#allocation2 + $0x70] sm:$0xff] (!%p848_p12), %v1142_v16  ;;  %333 = vst [vmem:[#allocation2 + $0x78] sm:$0xff] (!%p848_p12), %v1142_v16 }
  0x38 PF: > { %v1070_v17 = vld [vmem:[%s1249_s24] sm:$0xff]   ;;  %v1071_v18 = vld [vmem:[%s1249_s24 + $0x8] sm:$0xff]   ;;  %v1072_v19 = vld [vmem:[%s1249_s24 + $0x10] sm:$0xff]   ;;  %p865_p13 = scmp.ne.s32.totalorder %s1124_s14, 3 }
  0x39   : > { %965 = vmatprep.subr.bf16.mxu0 %v1070_v17  ;;  %997 = vmatprep.subr.bf16.mxu1 %v1070_v17  ;;  %v1073_v20 = vld [vmem:[%s1249_s24 + $0x18] sm:$0xff]   ;;  %v1078_v21 = vld [vmem:[%s1256_s12] sm:$0xff]   ;;  %v1075_v24 = vld [vmem:[%s1249_s24 + $0x28] sm:$0xff]  }
  0x3a   : > { %966 = vmatpush3.bf16.msra.mxu0 %v1070_v17  ;;  %1005 = vmatpush3.bf16.msra.mxu1 %v1070_v17  ;;  %v1079_v22 = vld [vmem:[%s1256_s12 + $0x20] sm:$0xff]   ;;  %v1076_v25 = vld [vmem:[%s1249_s24 + $0x30] sm:$0xff]   ;;  %v1077_v26 = vld [vmem:[%s1249_s24 + $0x38] sm:$0xff]  }
  0x3b   : > { %967 = vmatprep.subr.bf16.mxu0 %v1071_v18  ;;  %998 = vmatprep.subr.bf16.mxu1 %v1071_v18  ;;  %v1074_v23 = vld [vmem:[%s1249_s24 + $0x20] sm:$0xff]   ;;  %v1080_v27 = vld [vmem:[%s1256_s12 + $0x8] sm:$0xff]   ;;  %v1082_v29 = vld [vmem:[%s1256_s12 + $0x10] sm:$0xff]  }
  0x3c   : > { %981 = vmatprep.mubr.bf16.mxu0 %v1078_v21  ;;  %989 = vmatprep.mubr.bf16.mxu1 %v1079_v22  ;;  %v1081_v28 = vld [vmem:[%s1256_s12 + $0x28] sm:$0xff]   ;;  %v1083_v30 = vld [vmem:[%s1256_s12 + $0x30] sm:$0xff]   ;;  %v1084_v31 = vld [vmem:[%s1256_s12 + $0x18] sm:$0xff]  }
  0x3d   : > { %v1085_v32 = vld [vmem:[%s1256_s12 + $0x38] sm:$0xff]   ;;  %v336_v33 = vld [vmem:[#allocation2 + $0x10] sm:$0xff]  ;;  %v334_v35 = vld [vmem:[#allocation2] sm:$0xff] }
  0x3e   : > { %968 = vmatpush3.bf16.msra.mxu0 %v1071_v18  ;;  %1006 = vmatpush3.bf16.msra.mxu1 %v1071_v18  ;;  %v344_v34 = vld [vmem:[#allocation2 + $0x50] sm:$0xff]  ;;  %v342_v36 = vld [vmem:[#allocation2 + $0x40] sm:$0xff]  ;;  %v337_v39 = vld [vmem:[#allocation2 + $0x18] sm:$0xff] }
  0x3f   : > { %969 = vmatprep.subr.bf16.mxu0 %v1072_v19  ;;  %999 = vmatprep.subr.bf16.mxu1 %v1072_v19  ;;  %v345_v40 = vld [vmem:[#allocation2 + $0x58] sm:$0xff]  ;;  %v335_v45 = vld [vmem:[#allocation2 + $0x8] sm:$0xff]  ;;  %v340_v57 = vld [vmem:[#allocation2 + $0x30] sm:$0xff] }
  0x40   : > { %v343_v46 = vld [vmem:[#allocation2 + $0x48] sm:$0xff]  ;;  %v348_v58 = vld [vmem:[#allocation2 + $0x70] sm:$0xff]  ;;  %v338_v59 = vld [vmem:[#allocation2 + $0x20] sm:$0xff] }
  0x41   : > { %v346_v60 = vld [vmem:[#allocation2 + $0x60] sm:$0xff]  ;;  %v341_v63 = vld [vmem:[#allocation2 + $0x38] sm:$0xff]  ;;  %v339_v5 = vld [vmem:[#allocation2 + $0x28] sm:$0xff] }
  0x42   : > { %970 = vmatpush3.bf16.msra.mxu0 %v1072_v19  ;;  %1007 = vmatpush3.bf16.msra.mxu1 %v1072_v19  ;;  %v349_v0 = vld [vmem:[#allocation2 + $0x78] sm:$0xff]  ;;  %v347_v6 = vld [vmem:[#allocation2 + $0x68] sm:$0xff]  ;;  %v866_v19 = vld [vmem:[%s1310_s2] ss:$0 sm:$0xff] (!%p865_p13) }
  0x43   : > { %971 = vmatprep.subr.bf16.mxu0 %v1073_v20  ;;  %1000 = vmatprep.subr.bf16.mxu1 %v1073_v20 }
  0x46   : > { %972 = vmatpush3.bf16.msra.mxu0 %v1073_v20  ;;  %1008 = vmatpush3.bf16.msra.mxu1 %v1073_v20 }
  0x47   : > { %973 = vmatprep.subr.bf16.mxu0 %v1074_v23  ;;  %1001 = vmatprep.subr.bf16.mxu1 %v1074_v23 }
  0x4a   : > { %974 = vmatpush3.bf16.msra.mxu0 %v1074_v23  ;;  %1009 = vmatpush3.bf16.msra.mxu1 %v1074_v23 }
  0x4b   : > { %975 = vmatprep.subr.bf16.mxu0 %v1075_v24  ;;  %1002 = vmatprep.subr.bf16.mxu1 %v1075_v24 }
  0x4e   : > { %976 = vmatpush3.bf16.msra.mxu0 %v1075_v24  ;;  %1010 = vmatpush3.bf16.msra.mxu1 %v1075_v24 }
  0x4f   : > { %977 = vmatprep.subr.bf16.mxu0 %v1076_v25  ;;  %1003 = vmatprep.subr.bf16.mxu1 %v1076_v25 }
  0x52   : > { %978 = vmatpush3.bf16.msra.mxu0 %v1076_v25  ;;  %1011 = vmatpush3.bf16.msra.mxu1 %v1076_v25 }
  0x53   : > { %979 = vmatprep.subr.bf16.mxu0 %v1077_v26  ;;  %1004 = vmatprep.subr.bf16.mxu1 %v1077_v26 }
  0x56   : > { %980 = vmatpush3.bf16.msra.mxu0 %v1077_v26  ;;  %1012 = vmatpush3.bf16.msra.mxu1 %v1077_v26 }
  0x59   : > { %982 = vmatmul.mubr.bf16.vlgmr.msra.gmra.mrb[0].mxu0 %v1080_v27  ;;  %990 = vmatmul.mubr.bf16.vlgmr.msra.gmra.mrb[0].mxu1 %v1081_v28 }
  0x5a   : > { %985 = vmatprep.mubr.bf16.mxu0 %v1082_v29  ;;  %993 = vmatprep.mubr.bf16.mxu1 %v1083_v30 }
  0x61   : > { %986 = vmatmul.mubr.bf16.gmra.mrb[4].mxu0 %v1084_v31  ;;  %994 = vmatmul.mubr.bf16.gmra.mrb[4].mxu1 %v1085_v32 }
 0x12c   : > { %v983_v37 = vpop.f32.mrb[0].mxu0  ;;  %v991_v38 = vpop.f32.mrb[0].mxu1 }
 0x12d   : > { %v577_v41 = vadd.f32 %v983_v37, %v336_v33  ;;  %v585_v42 = vadd.f32 %v991_v38, %v344_v34  ;;  %v512_v43 = vpop.f32.mrb[1].mxu0  ;;  %v544_v44 = vpop.f32.mrb[1].mxu1 }
 0x12e   : > { %v575_v47 = vadd.f32 %v512_v43, %v334_v35  ;;  %v583_v48 = vadd.f32 %v544_v44, %v342_v36  ;;  %v984_v49 = vpop.f32.mrb[2].mxu0  ;;  %v992_v50 = vpop.f32.mrb[2].mxu1 }
 0x12f   : > { %593 = vst [vmem:[#allocation2 + $0x10] sm:$0xff] %v577_v41  ;;  %601 = vst [vmem:[#allocation2 + $0x50] sm:$0xff] %v585_v42  ;;  %v578_v51 = vadd.f32 %v984_v49, %v337_v39  ;;  %v586_v52 = vadd.f32 %v992_v50, %v345_v40  ;;  %v515_v53 = vpop.f32.mrb[3].mxu0  ;;  %v547_v54 = vpop.f32.mrb[3].mxu1 }
 0x130   : > { %591 = vst [vmem:[#allocation2] sm:$0xff] %v575_v47  ;;  %599 = vst [vmem:[#allocation2 + $0x40] sm:$0xff] %v583_v48  ;;  %v576_v55 = vadd.f32 %v515_v53, %v335_v45  ;;  %v584_v56 = vadd.f32 %v547_v54, %v343_v46 }
 0x131   : > { %594 = vst [vmem:[#allocation2 + $0x18] sm:$0xff] %v578_v51  ;;  %602 = vst [vmem:[#allocation2 + $0x58] sm:$0xff] %v586_v52 }
 0x132   : > { %592 = vst [vmem:[#allocation2 + $0x8] sm:$0xff] %v576_v55  ;;  %600 = vst [vmem:[#allocation2 + $0x48] sm:$0xff] %v584_v56 }
 0x134   : > { %v987_v61 = vpop.f32.mrb[4].mxu0  ;;  %v995_v62 = vpop.f32.mrb[4].mxu1  ;;  %610 = sbr.rel (%p865_p13) target bundleno = 330 (0x14a), region = 81 }
 0x135   : > { %v581_v1 = vadd.f32 %v987_v61, %v340_v57  ;;  %v589_v2 = vadd.f32 %v995_v62, %v348_v58  ;;  %v528_v3 = vpop.f32.mrb[5].mxu0  ;;  %v560_v4 = vpop.f32.mrb[5].mxu1 }
 0x136   : > { %v579_v7 = vadd.f32 %v528_v3, %v338_v59  ;;  %v587_v8 = vadd.f32 %v560_v4, %v346_v60  ;;  %v988_v9 = vpop.f32.mrb[6].mxu0  ;;  %v996_v10 = vpop.f32.mrb[6].mxu1  ;;  %v613_v22 = vld [vmem:[#allocation2 + $0x10] sm:$0xff] (!%p865_p13) }
 0x137   : > { %597 = vst [vmem:[#allocation2 + $0x30] sm:$0xff] %v581_v1  ;;  %605 = vst [vmem:[#allocation2 + $0x70] sm:$0xff] %v589_v2  ;;  %v582_v11 = vadd.f32 %v988_v9, %v341_v63  ;;  %v590_v12 = vadd.f32 %v996_v10, %v349_v0  ;;  %v531_v13 = vpop.f32.mrb[7].mxu0  ;;  %v563_v14 = vpop.f32.mrb[7].mxu1  ;;  %v611_v17 = vld [vmem:[#allocation2] sm:$0xff] (!%p865_p13)  ;;  %v636_v25 = vadd.f32 (!%p865_p13), %v866_v19, %v613_v22  ;;  %v621_v37 = vld [vmem:[#allocation2 + $0x50] sm:$0xff] (!%p865_p13) }
 0x138   : > { %595 = vst [vmem:[#allocation2 + $0x20] sm:$0xff] %v579_v7  ;;  %603 = vst [vmem:[#allocation2 + $0x60] sm:$0xff] %v587_v8  ;;  %v580_v15 = vadd.f32 %v531_v13, %v339_v5  ;;  %v588_v16 = vadd.f32 %v563_v14, %v347_v6  ;;  %v634_v20 = vadd.f32 (!%p865_p13), %v866_v19, %v611_v17  ;;  %v614_v23 = vld [vmem:[#allocation2 + $0x18] sm:$0xff] (!%p865_p13)  ;;  %v619_v35 = vld [vmem:[#allocation2 + $0x40] sm:$0xff] (!%p865_p13) }
 0x139   : > { %598 = vst [vmem:[#allocation2 + $0x38] sm:$0xff] %v582_v11  ;;  %606 = vst [vmem:[#allocation2 + $0x78] sm:$0xff] %v590_v12  ;;  %v612_v18 = vld [vmem:[#allocation2 + $0x8] sm:$0xff] (!%p865_p13)  ;;  %v637_v26 = vadd.f32 (!%p865_p13), %v866_v19, %v614_v23  ;;  %v652_v38 = vmax.f32 (!%p865_p13), %v636_v25, 0.0  ;;  %v622_v42 = vld [vmem:[#allocation2 + $0x58] sm:$0xff] (!%p865_p13)  ;;  %v642_v47 = vadd.f32 (!%p865_p13), %v866_v19, %v619_v35  ;;  %v644_v52 = vadd.f32 (!%p865_p13), %v866_v19, %v621_v37 }
 0x13a   : > { %596 = vst [vmem:[#allocation2 + $0x28] sm:$0xff] %v580_v15  ;;  %604 = vst [vmem:[#allocation2 + $0x68] sm:$0xff] %v588_v16  ;;  %v635_v21 = vadd.f32 (!%p865_p13), %v866_v19, %v612_v18  ;;  %v650_v31 = vmax.f32 (!%p865_p13), %v634_v20, 0.0  ;;  %v620_v36 = vld [vmem:[#allocation2 + $0x48] sm:$0xff] (!%p865_p13)  ;;  %v645_v57 = vadd.f32 (!%p865_p13), %v866_v19, %v622_v42 }
 0x13b   : > { %v653_v39 = vmax.f32 %v637_v26, 0.0  ;;  %v643_v51 = vadd.f32 %v866_v19, %v620_v36  ;;  %v658_v56 = vmax.f32 %v642_v47, 0.0  ;;  %v660_v61 = vmax.f32 %v644_v52, 0.0 }
 0x13c   : > { %v651_v32 = vmax.f32 %v635_v21, 0.0  ;;  %v661_v63 = vmax.f32 %v645_v57, 0.0 }
 0x13d   : > { %v910_v49 = vpack.c.bf16 %v653_v39, %v652_v38  ;;  %v659_v60 = vmax.f32 %v643_v51, 0.0 }
 0x13e   : > { %v617_v29 = vld [vmem:[#allocation2 + $0x30] sm:$0xff]  ;;  %v905_v44 = vpack.c.bf16 %v651_v32, %v650_v31  ;;  %v930_v5 = vpack.c.bf16 %v661_v63, %v660_v61 }
 0x13f   : > { %v615_v24 = vld [vmem:[#allocation2 + $0x20] sm:$0xff]  ;;  %v640_v34 = vadd.f32 %v866_v19, %v617_v29  ;;  %v625_v53 = vld [vmem:[#allocation2 + $0x70] sm:$0xff]  ;;  %942 = vst [vmem:[%s1254_s29 + $0x8] sm:$0xff] %v910_v49   ;;  %v925_v3 = vpack.c.bf16 %v659_v60, %v658_v56 }
 0x140   : > { %v638_v28 = vadd.f32 %v866_v19, %v615_v24  ;;  %v618_v30 = vld [vmem:[#allocation2 + $0x38] sm:$0xff]  ;;  %v623_v43 = vld [vmem:[#allocation2 + $0x60] sm:$0xff]  ;;  %906 = vst [vmem:[%s1254_s29] sm:$0xff] %v905_v44   ;;  %v648_v1 = vadd.f32 %v866_v19, %v625_v53  ;;  %946 = vst [vmem:[%s1254_s29 + $0x28] sm:$0xff] %v930_v5  }
 0x141   : > { %v616_v27 = vld [vmem:[#allocation2 + $0x28] sm:$0xff]  ;;  %v641_v41 = vadd.f32 %v866_v19, %v618_v30  ;;  %v656_v46 = vmax.f32 %v640_v34, 0.0  ;;  %v626_v54 = vld [vmem:[#allocation2 + $0x78] sm:$0xff]  ;;  %v646_v58 = vadd.f32 %v866_v19, %v623_v43  ;;  %945 = vst [vmem:[%s1254_s29 + $0x20] sm:$0xff] %v925_v3  }
 0x142   : > { %v639_v33 = vadd.f32 %v866_v19, %v616_v27  ;;  %v654_v40 = vmax.f32 %v638_v28, 0.0  ;;  %v624_v48 = vld [vmem:[#allocation2 + $0x68] sm:$0xff]  ;;  %v649_v2 = vadd.f32 %v866_v19, %v626_v54  ;;  %v664_v6 = vmax.f32 %v648_v1, 0.0 }
 0x143   : > { %v657_v50 = vmax.f32 %v641_v41, 0.0  ;;  %v647_v62 = vadd.f32 %v866_v19, %v624_v48  ;;  %v662_v0 = vmax.f32 %v646_v58, 0.0 }
 0x144   : > { %v655_v45 = vmax.f32 %v639_v33, 0.0  ;;  %v665_v7 = vmax.f32 %v649_v2, 0.0 }
 0x145   : > { %v920_v59 = vpack.c.bf16 %v657_v50, %v656_v46  ;;  %v663_v4 = vmax.f32 %v647_v62, 0.0 }
 0x146   : > { %v915_v55 = vpack.c.bf16 %v655_v45, %v654_v40  ;;  %v940_v9 = vpack.c.bf16 %v665_v7, %v664_v6 }
 0x147   : > { %944 = vst [vmem:[%s1254_s29 + $0x18] sm:$0xff] %v920_v59   ;;  %v935_v8 = vpack.c.bf16 %v663_v4, %v662_v0 }
 0x148   : > { %943 = vst [vmem:[%s1254_s29 + $0x10] sm:$0xff] %v915_v55   ;;  %948 = vst [vmem:[%s1254_s29 + $0x38] sm:$0xff] %v940_v9  }
 0x149   : > { %947 = vst [vmem:[%s1254_s29 + $0x30] sm:$0xff] %v935_v8  }
 0x14a PF: > { %s13_s18 = sadd.s32 1, %s1140_s18   ;;  %s1312_s12 = smov %s1120_s13 }
 0x14b   : > { %p10_p0 = scmp.ge.s32.totalorder %s13_s18, 18   ;;  %s1313_s13 = smov %s1214_s25 }
 0x14c   : > { %s1314_s14 = smov %s1132_s16  ;;  %s1315_s15 = smov %s1136_s17 }
 0x14d   : > { %s1316_s16 = smov %s1319_s19  ;;  %s1317_s17 = smov %s1323_s20 }
 0x14e   :  { %12 = sbr.rel (!%p10_p0) target bundleno = 4 (0x4), region = 119 }

// kernel: gcn_classifier_forward.7
= control target key start
LH: loop header
LB: loop body
LE: loop exit
PB: predicated region body
PF: predicated region fallthrough
CT: control target
= control target key end

     0   :  { %s1004_s12 = smov 0   ;;  %s1006_s13 = smov 0   ;;  %s1157_s0 = inlined_call_operand.vmem [shape: bf16[512,512], index: 0, kind: input, shape index: {}]   ;;  %s1158_s1 = inlined_call_operand.vmem [shape: bf16[512,128], index: 1, kind: input, shape index: {}]   ;;  %s1159_s2 = inlined_call_operand.vmem [shape: f32[1,128], index: 2, kind: input, shape index: {}]   ;;  %s1160_s3 = inlined_call_operand.vmem [shape: f32[512,128], index: 3, kind: output, shape index: {}]  }
   0x1   :  { %s1008_s14 = smov 0   ;;  %s1010_s15 = smov 0  }
   0x2   :  { %s1012_s16 = smov 0   ;;  %s1014_s17 = smov 0  }
   0x3   :  { %s1016_s18 = smov 0  }
   0x4 LB: > { %s22_s19 = sadd.s32 1, %s973_s16  ;;  %s25_s20 = sadd.s32 1, %s977_s17  ;;  %s981_s18 = sphi %s1016_s18, %s13_s18   ;;  %s977_s17 = sphi %s1014_s17, %s1166_s17   ;;  %s973_s16 = sphi %s1012_s16, %s1165_s16   ;;  %s969_s15 = sphi %s1010_s15, %s1164_s15   ;;  %s965_s14 = sphi %s1008_s14, %s1163_s14   ;;  %s961_s13 = sphi %s1006_s13, %s1162_s13   ;;  %s957_s12 = sphi %s1004_s12, %s1161_s12  }
   0x5   : > { %p23_p0 = scmp.ge.s32.totalorder %s22_s19, 4  ;;  %p41_p1 = scmp.ne.s32.totalorder %s961_s13, %s957_s12 }
   0x6   : > { %p42_p2 = scmp.eq.s32.totalorder %s981_s18, 0  ;;  %s34_s24 = sadd.s32 1, %s961_s13 }
   0x7   : > { %s1168_s19 = smov (%p23_p0, %s22_s19), 0  ;;  %s1170_s20 = smov (!%p23_p0, %s25_s20), %s977_s17 }
   0x8   : > { %p43_p3 = por %p42_p2, %p41_p1  ;;  %p27_p4 = scmp.ge.s32.totalorder %s1170_s20, 4 }
   0x9   : > { %s30_s21 = ssub.s32 %s973_s16, %s1168_s19  ;;  %p757_p6 = scmp.ge.s32.totalorder %s981_s18, 16 }
   0xa   : > { %s1172_s20 = smov (%p27_p4, %s1170_s20), 0 }
   0xb   : > { %s29_s22 = ssub.s32 %s977_s17, %s1172_s20  ;;  %143 = sbr.rel (%p757_p6) target bundleno = 35 (0x23), region = 20 }
   0xc   : > { %s31_s23 = sor.u32 %s30_s21, %s29_s22 }
   0xd   : > { %p32_p5 = scmp.eq.s32.totalorder %s31_s23, 0 }
   0xf   : > { %s1055_s25 = scalar_select %p32_p5, %s961_s13, %s34_s24  }
  0x12   : > { %146 = sbr.rel (!%p43_p3) target bundleno = 35 (0x23), region = 24  ;;  %s148_s26 = sand.u32 (%p43_p3), 1, %s961_s13  }
  0x13   : > { %s789_s27 = sshll.u32 (%p43_p3), %s977_s17, 6  ;;  %s758_s28 = sshll.u32 (%p43_p3), %s148_s26, 6 }
  0x14   : > { %s153_s29 = sadd.s32 (%p43_p3), %s973_s16, %s789_s27  ;;  %s150_s7 = scalar_lea.vmem (%p43_p3), [#allocation3], %s758_s28 }
  0x15   : > { %s761_s30 = sshll.u32 (%p43_p3), %s153_s29, 2 }
  0x16   : > { %s1064_s6 = scalar_lea.vmem (%p43_p3), %s1157_s0, %s761_s30 }
  0x17   : > { %v171_v0 = vld [vmem:[%s1064_s6] sm:$0xf] (%p43_p3)  ;;  %v173_v1 = vld [vmem:[%s1064_s6 + $0x10] sm:$0xf] (%p43_p3) }
  0x18   : > { %v175_v2 = vld [vmem:[%s1064_s6 + $0x20] sm:$0xf] (%p43_p3)  ;;  %172 = vst [vmem:[%s150_s7] sm:$0xf] (%p43_p3), %v171_v0  ;;  %174 = vst [vmem:[%s150_s7 + $0x4] sm:$0xf] (%p43_p3), %v173_v1 }
  0x19   : > { %176 = vst [vmem:[%s150_s7 + $0x8] sm:$0xf] %v175_v2  ;;  %v177_v3 = vld [vmem:[%s1064_s6 + $0x30] sm:$0xf]  ;;  %v179_v4 = vld [vmem:[%s1064_s6 + $0x40] sm:$0xf] }
  0x1a   : > { %v181_v5 = vld [vmem:[%s1064_s6 + $0x50] sm:$0xf]  ;;  %178 = vst [vmem:[%s150_s7 + $0xc] sm:$0xf] %v177_v3  ;;  %180 = vst [vmem:[%s150_s7 + $0x10] sm:$0xf] %v179_v4 }
  0x1b   : > { %182 = vst [vmem:[%s150_s7 + $0x14] sm:$0xf] %v181_v5  ;;  %v183_v6 = vld [vmem:[%s1064_s6 + $0x60] sm:$0xf]  ;;  %v185_v7 = vld [vmem:[%s1064_s6 + $0x70] sm:$0xf] }
  0x1c   : > { %v187_v8 = vld [vmem:[%s1064_s6 + $0x80] sm:$0xf]  ;;  %184 = vst [vmem:[%s150_s7 + $0x18] sm:$0xf] %v183_v6  ;;  %186 = vst [vmem:[%s150_s7 + $0x1c] sm:$0xf] %v185_v7 }
  0x1d   : > { %188 = vst [vmem:[%s150_s7 + $0x20] sm:$0xf] %v187_v8  ;;  %v189_v9 = vld [vmem:[%s1064_s6 + $0x90] sm:$0xf]  ;;  %v191_v10 = vld [vmem:[%s1064_s6 + $0xa0] sm:$0xf] }
  0x1e   : > { %v193_v11 = vld [vmem:[%s1064_s6 + $0xb0] sm:$0xf]  ;;  %190 = vst [vmem:[%s150_s7 + $0x24] sm:$0xf] %v189_v9  ;;  %192 = vst [vmem:[%s150_s7 + $0x28] sm:$0xf] %v191_v10 }
  0x1f   : > { %194 = vst [vmem:[%s150_s7 + $0x2c] sm:$0xf] %v193_v11  ;;  %v195_v12 = vld [vmem:[%s1064_s6 + $0xc0] sm:$0xf]  ;;  %v197_v13 = vld [vmem:[%s1064_s6 + $0xd0] sm:$0xf] }
  0x20   : > { %v199_v14 = vld [vmem:[%s1064_s6 + $0xe0] sm:$0xf]  ;;  %196 = vst [vmem:[%s150_s7 + $0x30] sm:$0xf] %v195_v12  ;;  %198 = vst [vmem:[%s150_s7 + $0x34] sm:$0xf] %v197_v13 }
  0x21   : > { %200 = vst [vmem:[%s150_s7 + $0x38] sm:$0xf] %v199_v14  ;;  %v201_v15 = vld [vmem:[%s1064_s6 + $0xf0] sm:$0xf] }
  0x22   : > { %202 = vst [vmem:[%s150_s7 + $0x3c] sm:$0xf] %v201_v15 }
  0x23 PF: > { %p762_p7 = scmp.ge.s32.totalorder %s981_s18, 1  ;;  %p265_p8 = scmp.lt.s32.totalorder %s981_s18, 17 }
  0x25   : > { %p266_p9 = pnand %p762_p7, %p265_p8 }
  0x26   : > { %s272_s8 = sand.u32 (!%p266_p9), 1, %s957_s12   ;;  %s764_s9 = sshll.u32 (!%p266_p9), %s965_s14, 4 }
  0x27   : > { %269 = sbr.rel (%p266_p9) target bundleno = 326 (0x146), region = 69  ;;  %s763_s10 = sshll.u32 (!%p266_p9), %s272_s8, 6 }
  0x28   : > { %p302_p10 = scmp.lt.s32.totalorder (!%p266_p9), %s764_s9, 63  ;;  %s766_s11 = sshll.u32 (!%p266_p9), %s969_s15, 4 }
  0x29   : > { %p308_p11 = scmp.lt.s32.totalorder (!%p266_p9), %s766_s11, 63  ;;  %s1097_s12 = scalar_lea.vmem (!%p266_p9), [#allocation3], %s763_s10 }
  0x2a   : > { %p768_p12 = scmp.ne.s32.totalorder (!%p266_p9), %s965_s14, 0 }
  0x2e   : > { %s1174_s9 = smov (!%p302_p10, %s764_s9), 63  ;;  %s1176_s11 = smov (!%p308_p11, %s766_s11), 63 }
  0x2f   : > { %s765_s21 = sshll.u32 %s1174_s9, 2  ;;  %s767_s26 = sshll.u32 %s1176_s11, 3  ;;  %v983_v16 = vmov (!%p768_p12), 0.0  }
  0x30   : > { %s1090_s24 = scalar_lea.vmem %s1158_s1, %s765_s21  ;;  %s1095_s29 = scalar_lea.vmem %s1160_s3, %s767_s26  ;;  %318 = vst [vmem:[#allocation2] sm:$0xff] (!%p768_p12), %v983_v16  ;;  %319 = vst [vmem:[#allocation2 + $0x8] sm:$0xff] (!%p768_p12), %v983_v16 }
  0x31   : > { %317 = sbr.rel (%p768_p12) target bundleno = 56 (0x38), region = 77  ;;  %320 = vst [vmem:[#allocation2 + $0x10] sm:$0xff] (!%p768_p12), %v983_v16  ;;  %321 = vst [vmem:[#allocation2 + $0x18] sm:$0xff] (!%p768_p12), %v983_v16 }
  0x32   : > { %322 = vst [vmem:[#allocation2 + $0x20] sm:$0xff] (!%p768_p12), %v983_v16  ;;  %323 = vst [vmem:[#allocation2 + $0x28] sm:$0xff] (!%p768_p12), %v983_v16 }
  0x33   : > { %324 = vst [vmem:[#allocation2 + $0x30] sm:$0xff] (!%p768_p12), %v983_v16  ;;  %325 = vst [vmem:[#allocation2 + $0x38] sm:$0xff] (!%p768_p12), %v983_v16 }
  0x34   : > { %326 = vst [vmem:[#allocation2 + $0x40] sm:$0xff] (!%p768_p12), %v983_v16  ;;  %327 = vst [vmem:[#allocation2 + $0x48] sm:$0xff] (!%p768_p12), %v983_v16 }
  0x35   : > { %328 = vst [vmem:[#allocation2 + $0x50] sm:$0xff] (!%p768_p12), %v983_v16  ;;  %329 = vst [vmem:[#allocation2 + $0x58] sm:$0xff] (!%p768_p12), %v983_v16 }
  0x36   : > { %330 = vst [vmem:[#allocation2 + $0x60] sm:$0xff] (!%p768_p12), %v983_v16  ;;  %331 = vst [vmem:[#allocation2 + $0x68] sm:$0xff] (!%p768_p12), %v983_v16 }
  0x37   : > { %332 = vst [vmem:[#allocation2 + $0x70] sm:$0xff] (!%p768_p12), %v983_v16  ;;  %333 = vst [vmem:[#allocation2 + $0x78] sm:$0xff] (!%p768_p12), %v983_v16 }
  0x38 PF: > { %v911_v17 = vld [vmem:[%s1090_s24] sm:$0xff]   ;;  %v912_v18 = vld [vmem:[%s1090_s24 + $0x8] sm:$0xff]   ;;  %v913_v19 = vld [vmem:[%s1090_s24 + $0x10] sm:$0xff]   ;;  %p785_p13 = scmp.ne.s32.totalorder %s965_s14, 3 }
  0x39   : > { %806 = vmatprep.subr.bf16.mxu0 %v911_v17  ;;  %838 = vmatprep.subr.bf16.mxu1 %v911_v17  ;;  %v914_v20 = vld [vmem:[%s1090_s24 + $0x18] sm:$0xff]   ;;  %v919_v21 = vld [vmem:[%s1097_s12] sm:$0xff]   ;;  %v916_v24 = vld [vmem:[%s1090_s24 + $0x28] sm:$0xff]  }
  0x3a   : > { %807 = vmatpush3.bf16.msra.mxu0 %v911_v17  ;;  %846 = vmatpush3.bf16.msra.mxu1 %v911_v17  ;;  %v920_v22 = vld [vmem:[%s1097_s12 + $0x20] sm:$0xff]   ;;  %v917_v25 = vld [vmem:[%s1090_s24 + $0x30] sm:$0xff]   ;;  %v918_v26 = vld [vmem:[%s1090_s24 + $0x38] sm:$0xff]  }
  0x3b   : > { %808 = vmatprep.subr.bf16.mxu0 %v912_v18  ;;  %839 = vmatprep.subr.bf16.mxu1 %v912_v18  ;;  %v915_v23 = vld [vmem:[%s1090_s24 + $0x20] sm:$0xff]   ;;  %v921_v27 = vld [vmem:[%s1097_s12 + $0x8] sm:$0xff]   ;;  %v923_v29 = vld [vmem:[%s1097_s12 + $0x10] sm:$0xff]  }
  0x3c   : > { %822 = vmatprep.mubr.bf16.mxu0 %v919_v21  ;;  %830 = vmatprep.mubr.bf16.mxu1 %v920_v22  ;;  %v922_v28 = vld [vmem:[%s1097_s12 + $0x28] sm:$0xff]   ;;  %v924_v30 = vld [vmem:[%s1097_s12 + $0x30] sm:$0xff]   ;;  %v925_v31 = vld [vmem:[%s1097_s12 + $0x18] sm:$0xff]  }
  0x3d   : > { %v926_v32 = vld [vmem:[%s1097_s12 + $0x38] sm:$0xff]   ;;  %v336_v33 = vld [vmem:[#allocation2 + $0x10] sm:$0xff]  ;;  %v334_v35 = vld [vmem:[#allocation2] sm:$0xff] }
  0x3e   : > { %809 = vmatpush3.bf16.msra.mxu0 %v912_v18  ;;  %847 = vmatpush3.bf16.msra.mxu1 %v912_v18  ;;  %v344_v34 = vld [vmem:[#allocation2 + $0x50] sm:$0xff]  ;;  %v342_v36 = vld [vmem:[#allocation2 + $0x40] sm:$0xff]  ;;  %v337_v39 = vld [vmem:[#allocation2 + $0x18] sm:$0xff] }
  0x3f   : > { %810 = vmatprep.subr.bf16.mxu0 %v913_v19  ;;  %840 = vmatprep.subr.bf16.mxu1 %v913_v19  ;;  %v345_v40 = vld [vmem:[#allocation2 + $0x58] sm:$0xff]  ;;  %v335_v45 = vld [vmem:[#allocation2 + $0x8] sm:$0xff]  ;;  %v340_v57 = vld [vmem:[#allocation2 + $0x30] sm:$0xff] }
  0x40   : > { %v343_v46 = vld [vmem:[#allocation2 + $0x48] sm:$0xff]  ;;  %v348_v58 = vld [vmem:[#allocation2 + $0x70] sm:$0xff]  ;;  %v338_v59 = vld [vmem:[#allocation2 + $0x20] sm:$0xff] }
  0x41   : > { %v346_v60 = vld [vmem:[#allocation2 + $0x60] sm:$0xff]  ;;  %v341_v63 = vld [vmem:[#allocation2 + $0x38] sm:$0xff]  ;;  %v339_v5 = vld [vmem:[#allocation2 + $0x28] sm:$0xff] }
  0x42   : > { %811 = vmatpush3.bf16.msra.mxu0 %v913_v19  ;;  %848 = vmatpush3.bf16.msra.mxu1 %v913_v19  ;;  %v349_v0 = vld [vmem:[#allocation2 + $0x78] sm:$0xff]  ;;  %v347_v6 = vld [vmem:[#allocation2 + $0x68] sm:$0xff]  ;;  %v786_v18 = vld [vmem:[%s1159_s2] ss:$0 sm:$0xff] (!%p785_p13) }
  0x43   : > { %812 = vmatprep.subr.bf16.mxu0 %v914_v20  ;;  %841 = vmatprep.subr.bf16.mxu1 %v914_v20 }
  0x46   : > { %813 = vmatpush3.bf16.msra.mxu0 %v914_v20  ;;  %849 = vmatpush3.bf16.msra.mxu1 %v914_v20 }
  0x47   : > { %814 = vmatprep.subr.bf16.mxu0 %v915_v23  ;;  %842 = vmatprep.subr.bf16.mxu1 %v915_v23 }
  0x4a   : > { %815 = vmatpush3.bf16.msra.mxu0 %v915_v23  ;;  %850 = vmatpush3.bf16.msra.mxu1 %v915_v23 }
  0x4b   : > { %816 = vmatprep.subr.bf16.mxu0 %v916_v24  ;;  %843 = vmatprep.subr.bf16.mxu1 %v916_v24 }
  0x4e   : > { %817 = vmatpush3.bf16.msra.mxu0 %v916_v24  ;;  %851 = vmatpush3.bf16.msra.mxu1 %v916_v24 }
  0x4f   : > { %818 = vmatprep.subr.bf16.mxu0 %v917_v25  ;;  %844 = vmatprep.subr.bf16.mxu1 %v917_v25 }
  0x52   : > { %819 = vmatpush3.bf16.msra.mxu0 %v917_v25  ;;  %852 = vmatpush3.bf16.msra.mxu1 %v917_v25 }
  0x53   : > { %820 = vmatprep.subr.bf16.mxu0 %v918_v26  ;;  %845 = vmatprep.subr.bf16.mxu1 %v918_v26 }
  0x56   : > { %821 = vmatpush3.bf16.msra.mxu0 %v918_v26  ;;  %853 = vmatpush3.bf16.msra.mxu1 %v918_v26 }
  0x59   : > { %823 = vmatmul.mubr.bf16.vlgmr.msra.gmra.mrb[0].mxu0 %v921_v27  ;;  %831 = vmatmul.mubr.bf16.vlgmr.msra.gmra.mrb[0].mxu1 %v922_v28 }
  0x5a   : > { %826 = vmatprep.mubr.bf16.mxu0 %v923_v29  ;;  %834 = vmatprep.mubr.bf16.mxu1 %v924_v30 }
  0x61   : > { %827 = vmatmul.mubr.bf16.gmra.mrb[4].mxu0 %v925_v31  ;;  %835 = vmatmul.mubr.bf16.gmra.mrb[4].mxu1 %v926_v32 }
 0x12c   : > { %v824_v37 = vpop.f32.mrb[0].mxu0  ;;  %v832_v38 = vpop.f32.mrb[0].mxu1 }
 0x12d   : > { %v577_v41 = vadd.f32 %v824_v37, %v336_v33  ;;  %v585_v42 = vadd.f32 %v832_v38, %v344_v34  ;;  %v512_v43 = vpop.f32.mrb[1].mxu0  ;;  %v544_v44 = vpop.f32.mrb[1].mxu1 }
 0x12e   : > { %v575_v47 = vadd.f32 %v512_v43, %v334_v35  ;;  %v583_v48 = vadd.f32 %v544_v44, %v342_v36  ;;  %v825_v49 = vpop.f32.mrb[2].mxu0  ;;  %v833_v50 = vpop.f32.mrb[2].mxu1 }
 0x12f   : > { %593 = vst [vmem:[#allocation2 + $0x10] sm:$0xff] %v577_v41  ;;  %601 = vst [vmem:[#allocation2 + $0x50] sm:$0xff] %v585_v42  ;;  %v578_v51 = vadd.f32 %v825_v49, %v337_v39  ;;  %v586_v52 = vadd.f32 %v833_v50, %v345_v40  ;;  %v515_v53 = vpop.f32.mrb[3].mxu0  ;;  %v547_v54 = vpop.f32.mrb[3].mxu1 }
 0x130   : > { %591 = vst [vmem:[#allocation2] sm:$0xff] %v575_v47  ;;  %599 = vst [vmem:[#allocation2 + $0x40] sm:$0xff] %v583_v48  ;;  %v576_v55 = vadd.f32 %v515_v53, %v335_v45  ;;  %v584_v56 = vadd.f32 %v547_v54, %v343_v46 }
 0x131   : > { %594 = vst [vmem:[#allocation2 + $0x18] sm:$0xff] %v578_v51  ;;  %602 = vst [vmem:[#allocation2 + $0x58] sm:$0xff] %v586_v52 }
 0x132   : > { %592 = vst [vmem:[#allocation2 + $0x8] sm:$0xff] %v576_v55  ;;  %600 = vst [vmem:[#allocation2 + $0x48] sm:$0xff] %v584_v56 }
 0x134   : > { %v828_v61 = vpop.f32.mrb[4].mxu0  ;;  %v836_v62 = vpop.f32.mrb[4].mxu1  ;;  %610 = sbr.rel (%p785_p13) target bundleno = 326 (0x146), region = 81 }
 0x135   : > { %v581_v1 = vadd.f32 %v828_v61, %v340_v57  ;;  %v589_v2 = vadd.f32 %v836_v62, %v348_v58  ;;  %v528_v3 = vpop.f32.mrb[5].mxu0  ;;  %v560_v4 = vpop.f32.mrb[5].mxu1 }
 0x136   : > { %v579_v7 = vadd.f32 %v528_v3, %v338_v59  ;;  %v587_v8 = vadd.f32 %v560_v4, %v346_v60  ;;  %v829_v9 = vpop.f32.mrb[6].mxu0  ;;  %v837_v10 = vpop.f32.mrb[6].mxu1  ;;  %v613_v22 = vld [vmem:[#allocation2 + $0x10] sm:$0xff] (!%p785_p13) }
 0x137   : > { %597 = vst [vmem:[#allocation2 + $0x30] sm:$0xff] %v581_v1  ;;  %605 = vst [vmem:[#allocation2 + $0x70] sm:$0xff] %v589_v2  ;;  %v582_v11 = vadd.f32 %v829_v9, %v341_v63  ;;  %v590_v12 = vadd.f32 %v837_v10, %v349_v0  ;;  %v531_v13 = vpop.f32.mrb[7].mxu0  ;;  %v563_v14 = vpop.f32.mrb[7].mxu1  ;;  %v611_v17 = vld [vmem:[#allocation2] sm:$0xff] (!%p785_p13)  ;;  %v636_v25 = vadd.f32 (!%p785_p13), %v786_v18, %v613_v22  ;;  %v621_v36 = vld [vmem:[#allocation2 + $0x50] sm:$0xff] (!%p785_p13) }
 0x138   : > { %595 = vst [vmem:[#allocation2 + $0x20] sm:$0xff] %v579_v7  ;;  %603 = vst [vmem:[#allocation2 + $0x60] sm:$0xff] %v587_v8  ;;  %v580_v15 = vadd.f32 %v531_v13, %v339_v5  ;;  %v588_v16 = vadd.f32 %v563_v14, %v347_v6  ;;  %v634_v20 = vadd.f32 (!%p785_p13), %v786_v18, %v611_v17  ;;  %v614_v23 = vld [vmem:[#allocation2 + $0x18] sm:$0xff] (!%p785_p13)  ;;  %v619_v34 = vld [vmem:[#allocation2 + $0x40] sm:$0xff] (!%p785_p13) }
 0x139   : > { %598 = vst [vmem:[#allocation2 + $0x38] sm:$0xff] %v582_v11  ;;  %606 = vst [vmem:[#allocation2 + $0x78] sm:$0xff] %v590_v12  ;;  %v612_v19 = vld [vmem:[#allocation2 + $0x8] sm:$0xff] (!%p785_p13)  ;;  %v637_v26 = vadd.f32 (!%p785_p13), %v786_v18, %v614_v23  ;;  %v642_v37 = vadd.f32 (!%p785_p13), %v786_v18, %v619_v34  ;;  %v644_v39 = vadd.f32 (!%p785_p13), %v786_v18, %v621_v36  ;;  %v622_v40 = vld [vmem:[#allocation2 + $0x58] sm:$0xff] (!%p785_p13) }
 0x13a   : > { %596 = vst [vmem:[#allocation2 + $0x28] sm:$0xff] %v580_v15  ;;  %604 = vst [vmem:[#allocation2 + $0x68] sm:$0xff] %v588_v16  ;;  %v635_v21 = vadd.f32 (!%p785_p13), %v786_v18, %v612_v19  ;;  %v620_v35 = vld [vmem:[#allocation2 + $0x48] sm:$0xff] (!%p785_p13)  ;;  %v645_v43 = vadd.f32 (!%p785_p13), %v786_v18, %v622_v40 }
 0x13b   : > { %650 = vst [vmem:[%s1095_s29] sm:$0xff] %v634_v20  ;;  %652 = vst [vmem:[%s1095_s29 + $0x10] sm:$0xff] %v636_v25  ;;  %v643_v38 = vadd.f32 %v786_v18, %v620_v35 }
 0x13c   : > { %651 = vst [vmem:[%s1095_s29 + $0x8] sm:$0xff] %v635_v21  ;;  %653 = vst [vmem:[%s1095_s29 + $0x18] sm:$0xff] %v637_v26 }
 0x13d   : > { %658 = vst [vmem:[%s1095_s29 + $0x40] sm:$0xff] %v642_v37  ;;  %659 = vst [vmem:[%s1095_s29 + $0x48] sm:$0xff] %v643_v38 }
 0x13e   : > { %v617_v29 = vld [vmem:[#allocation2 + $0x30] sm:$0xff]  ;;  %660 = vst [vmem:[%s1095_s29 + $0x50] sm:$0xff] %v644_v39  ;;  %661 = vst [vmem:[%s1095_s29 + $0x58] sm:$0xff] %v645_v43 }
 0x13f   : > { %v615_v24 = vld [vmem:[#allocation2 + $0x20] sm:$0xff]  ;;  %v640_v32 = vadd.f32 %v786_v18, %v617_v29  ;;  %v625_v46 = vld [vmem:[#allocation2 + $0x70] sm:$0xff] }
 0x140   : > { %v638_v27 = vadd.f32 %v786_v18, %v615_v24  ;;  %v618_v30 = vld [vmem:[#allocation2 + $0x38] sm:$0xff]  ;;  %v623_v41 = vld [vmem:[#allocation2 + $0x60] sm:$0xff]  ;;  %v648_v48 = vadd.f32 %v786_v18, %v625_v46 }
 0x141   : > { %v616_v28 = vld [vmem:[#allocation2 + $0x28] sm:$0xff]  ;;  %v641_v33 = vadd.f32 %v786_v18, %v618_v30  ;;  %656 = vst [vmem:[%s1095_s29 + $0x30] sm:$0xff] %v640_v32  ;;  %v646_v44 = vadd.f32 %v786_v18, %v623_v41  ;;  %v626_v47 = vld [vmem:[#allocation2 + $0x78] sm:$0xff] }
 0x142   : > { %v639_v31 = vadd.f32 %v786_v18, %v616_v28  ;;  %654 = vst [vmem:[%s1095_s29 + $0x20] sm:$0xff] %v638_v27  ;;  %v624_v42 = vld [vmem:[#allocation2 + $0x68] sm:$0xff]  ;;  %v649_v49 = vadd.f32 %v786_v18, %v626_v47  ;;  %664 = vst [vmem:[%s1095_s29 + $0x70] sm:$0xff] %v648_v48 }
 0x143   : > { %657 = vst [vmem:[%s1095_s29 + $0x38] sm:$0xff] %v641_v33  ;;  %v647_v45 = vadd.f32 %v786_v18, %v624_v42  ;;  %662 = vst [vmem:[%s1095_s29 + $0x60] sm:$0xff] %v646_v44 }
 0x144   : > { %655 = vst [vmem:[%s1095_s29 + $0x28] sm:$0xff] %v639_v31  ;;  %665 = vst [vmem:[%s1095_s29 + $0x78] sm:$0xff] %v649_v49 }
 0x145   : > { %663 = vst [vmem:[%s1095_s29 + $0x68] sm:$0xff] %v647_v45 }
 0x146 PF: > { %s13_s18 = sadd.s32 1, %s981_s18   ;;  %s1161_s12 = smov %s961_s13 }
 0x147   : > { %p10_p0 = scmp.ge.s32.totalorder %s13_s18, 18   ;;  %s1162_s13 = smov %s1055_s25 }
 0x148   : > { %s1163_s14 = smov %s973_s16  ;;  %s1164_s15 = smov %s977_s17 }
 0x149   : > { %s1165_s16 = smov %s1168_s19  ;;  %s1166_s17 = smov %s1172_s20 }
 0x14a   :  { %12 = sbr.rel (!%p10_p0) target bundleno = 4 (0x4), region = 119 }

</bundles_post_ra>
